<compile_context>
chip_gen: v5e
topology: v5e:2x2
jax: 0.10.0
libtpu: 0.0.40
codegen_flags: <defaults>
</compile_context>

<pallas_src>
import jax
import jax.numpy as jnp
from jax.experimental import pallas as pl
from jax.experimental.pallas import tpu as pltpu


def _round_up(x, m):
    return ((x + m - 1) // m) * m


def _pick_tm(M, K_pad, E_pad, out_bytes, budget=24 << 20):
    """Largest M tile that (a) divides M when possible and (b) fits the VMEM budget.

    budget is conservative (24 MiB) so the kernel fits v7x's default scoped
    VMEM (32 MiB) with headroom; v5e/v6e have more.
    """
    # Weight + bias are grid-resident (constant index map); x and out are
    # double-buffered per M tile.
    fixed = 2 * K_pad * E_pad * 2 + 2 * E_pad * 4
    per_row = 2 * K_pad * 2 + 2 * E_pad * out_bytes
    cap = max(8, (budget - fixed) // max(per_row, 1))
    cap = max(8, (cap // 8) * 8)

    if M <= cap and M <= 2048:
        # Single (or few) tile case: exact fit, minimal padding.
        return _round_up(M, 8)
    for t in (2048, 1024, 512, 256, 128):
        if t <= cap and M % t == 0:
            return t
    for t in (2048, 1024, 512, 256, 128):
        if t <= cap:
            return t
    return 128  # last resort for extreme K/E


def _patch_embed_kernel(x_ref, w_ref, b_ref, o_ref):
    # x_ref: (TM, K_pad)     bf16 patches
    # w_ref: (K_pad, E_pad)  bf16 projection weight (VMEM-resident across grid)
    # b_ref: (1, E_pad)      f32 bias (VMEM-resident across grid)
    # o_ref: (TM, E_pad)     output tile
    acc = jnp.dot(x_ref[...], w_ref[...], preferred_element_type=jnp.float32)
    o_ref[...] = (acc + b_ref[...]).astype(o_ref.dtype)


def patch_embed_forward(x, weight, bias, patch_size, out_dtype=None):
    """Equivalent of PatchEmbed.forward(x) with flatten=True, norm=Identity.

    x:      (B, C, H, W)   NCHW
    weight: (E, C, ph, pw) Conv2d weight
    bias:   (E,)           Conv2d bias
    out_dtype: output dtype; defaults to x.dtype.  Pass jnp.bfloat16 to halve
               output HBM writeback (precision already bounded by bf16 MXU
               operands).
    returns (B, num_patches, E)
    """
    B, C, H, W = x.shape
    E = weight.shape[0]
    ph, pw = patch_size
    assert H % ph == 0 and W % pw == 0, "image size must be divisible by patch size"
    gh, gw = H // ph, W // pw
    N = gh * gw
    K = C * ph * pw
    M = B * N

    out_dtype = x.dtype if out_dtype is None else out_dtype
    out_bytes = jnp.dtype(out_dtype).itemsize

    # --- padded problem dims (lane-aligned K and E) ---
    K_pad = _round_up(K, 128)
    E_pad = _round_up(E, 128)
    TM = _pick_tm(M, K_pad, E_pad, out_bytes)
    M_pad = _round_up(M, TM)

    # --- glue: cast to bf16 FIRST, then patch extraction ((c, kh, kw) order,
    # row-major patch grid) + zero padding.  Padding is exact for the matmul.
    xb = x.astype(jnp.bfloat16)
    xp = xb.reshape(B, C, gh, ph, gw, pw)
    xp = jnp.transpose(xp, (0, 2, 4, 1, 3, 5))          # (B, gh, gw, C, ph, pw)
    xp = xp.reshape(M, K)
    if M_pad != M or K_pad != K:
        xp = jnp.pad(xp, ((0, M_pad - M), (0, K_pad - K)))

    w_mat = weight.astype(jnp.bfloat16).reshape(E, K).T  # (K, E) bf16
    if K_pad != K or E_pad != E:
        w_mat = jnp.pad(w_mat, ((0, K_pad - K), (0, E_pad - E)))
    b_mat = bias.astype(jnp.float32)
    if E_pad != E:
        b_mat = jnp.pad(b_mat, (0, E_pad - E))
    b_mat = b_mat.reshape(1, E_pad)

    # Actual traffic: x read once, weight/bias read once, output written once.
    bytes_accessed = (M_pad * K_pad * 2) + (K_pad * E_pad * 2) + (E_pad * 4) \
        + (M_pad * E_pad * out_bytes)

    out = pl.pallas_call(
        _patch_embed_kernel,
        out_shape=jax.ShapeDtypeStruct((M_pad, E_pad), out_dtype),
        grid_spec=pltpu.PrefetchScalarGridSpec(
            num_scalar_prefetch=0,
            grid=(M_pad // TM,),
            in_specs=[
                pl.BlockSpec((TM, K_pad), lambda i: (i, 0)),      # streamed x
                pl.BlockSpec((K_pad, E_pad), lambda i: (0, 0)),   # resident weight
                pl.BlockSpec((1, E_pad), lambda i: (0, 0)),       # resident bias
            ],
            out_specs=pl.BlockSpec((TM, E_pad), lambda i: (i, 0)),
        ),
        compiler_params=pltpu.CompilerParams(
            dimension_semantics=("parallel",),
            allow_input_fusion=[True, False, False],
        ),
        cost_estimate=pl.CostEstimate(
            flops=2 * M_pad * K_pad * E_pad,
            transcendentals=0,
            bytes_accessed=bytes_accessed),
    )(xp, w_mat, b_mat)

    if M_pad != M or E_pad != E:
        out = out[:M, :E]
    return out.reshape(B, N, E)


def _reference(x, weight, bias, patch_size):
    # Pure-JAX f32 reference: strided conv, flatten(2), transpose(1, 2).
    y = jax.lax.conv_general_dilated(
        x, weight,
        window_strides=patch_size,
        padding="VALID",
        dimension_numbers=("NCHW", "OIHW", "NCHW"),
    )
    y = y + bias[None, :, None, None]
    B, E, gh, gw = y.shape
    return jnp.transpose(y.reshape(B, E, gh * gw), (0, 2, 1))


if __name__ == "__main__":
    # Small shapes: img_size=16, patch_size=4, in_chans=4, embed_dim=32, batch=2
    B, C, H, W = 2, 4, 16, 16
    ph = pw = 4
    E = 32

    key = jax.random.PRNGKey(0)
    kx, kw, kb = jax.random.split(key, 3)
    x = jax.random.normal(kx, (B, C, H, W), dtype=jnp.float32)
    weight = 0.05 * jax.random.normal(kw, (E, C, ph, pw), dtype=jnp.float32)
    bias = 0.01 * jax.random.normal(kb, (E,), dtype=jnp.float32)

    out = patch_embed_forward(x, weight, bias, (ph, pw))
    out = jax.block_until_ready(out)

    ref = _reference(x, weight, bias, (ph, pw))
    assert out.shape == (B, (H // ph) * (W // pw), E), out.shape
    # bf16 operands -> loosened tolerance vs the f32 conv reference.
    assert jnp.allclose(out, ref, atol=5e-2, rtol=5e-2), "mismatch vs reference"

    print("KERNEL_OK")
</pallas_src>

<mosaic_0001>
module attributes {stable_mosaic.version = 11 : i64} {
  func.func @_patch_embed_kernel(%arg0: i32, %arg1: memref<32x128xbf16, #tpu.memory_space<vmem>>, %arg2: memref<128x128xbf16, #tpu.memory_space<vmem>>, %arg3: memref<1x128xf32, #tpu.memory_space<vmem>>, %arg4: memref<32x128xf32, #tpu.memory_space<vmem>>) attributes {dimension_semantics = [#tpu.dimension_semantics<parallel>], iteration_bounds = array<i64: 1>, scalar_prefetch = 0 : i64, scratch_operands = 0 : i64, tpu.core_type = #tpu.core_type<tc>, window_params = [{transform_indices = @transform_0, window_bounds = array<i64: 32, 128>}, {pipeline_mode = #tpu.pipeline_mode<synchronous>, transform_indices = @transform_1, window_bounds = array<i64: 128, 128>}, {pipeline_mode = #tpu.pipeline_mode<synchronous>, transform_indices = @transform_2, window_bounds = array<i64: 1, 128>}, {transform_indices = @transform_3, window_bounds = array<i64: 32, 128>}]} {
    %c0 = arith.constant 0 : index
    %c0_0 = arith.constant 0 : index
    %0 = vector.load %arg1[%c0, %c0_0] : memref<32x128xbf16, #tpu.memory_space<vmem>>, vector<32x128xbf16>
    %c0_1 = arith.constant 0 : index
    %c0_2 = arith.constant 0 : index
    %1 = vector.load %arg2[%c0_1, %c0_2] : memref<128x128xbf16, #tpu.memory_space<vmem>>, vector<128x128xbf16>
    %cst = arith.constant dense<0.000000e+00> : vector<32x128xf32>
    %2 = tpu.matmul %0, %1, %cst {dimension_numbers = #tpu.dot_dimension_numbers<[1], [0], [0], [1], [0, 0, 1, 1], [], []>} : vector<32x128xbf16>, vector<128x128xbf16>, vector<32x128xf32> -> vector<32x128xf32>
    %c0_3 = arith.constant 0 : index
    %c0_4 = arith.constant 0 : index
    %3 = vector.load %arg3[%c0_3, %c0_4] : memref<1x128xf32, #tpu.memory_space<vmem>>, vector<1x128xf32>
    %4 = vector.broadcast %3 : vector<1x128xf32> to vector<32x128xf32>
    %5 = arith.addf %2, %4 : vector<32x128xf32>
    %c0_5 = arith.constant 0 : index
    %c0_6 = arith.constant 0 : index
    %6 = vector.load %arg4[%c0_5, %c0_6] : memref<32x128xf32, #tpu.memory_space<vmem>>, vector<32x128xf32>
    tpu.vector_store %arg4[%c0_5, %c0_6], %5 {strides = array<i32>} : memref<32x128xf32, #tpu.memory_space<vmem>>, vector<32x128xf32>,
    return
  }
  func.func @transform_0(%arg0: i32) -> (i32, i32) {
    %c0_i32 = arith.constant 0 : i32
    %c0_i32_0 = arith.constant 0 : i32
    return %arg0, %c0_i32 : i32, i32
  }
  func.func @transform_1(%arg0: i32) -> (i32, i32) {
    %c0_i32 = arith.constant 0 : i32
    %c0_i32_0 = arith.constant 0 : i32
    %c0_i32_1 = arith.constant 0 : i32
    return %c0_i32, %c0_i32_0 : i32, i32
  }
  func.func @transform_2(%arg0: i32) -> (i32, i32) {
    %c0_i32 = arith.constant 0 : i32
    %c0_i32_0 = arith.constant 0 : i32
    %c0_i32_1 = arith.constant 0 : i32
    return %c0_i32, %c0_i32_0 : i32, i32
  }
  func.func @transform_3(%arg0: i32) -> (i32, i32) {
    %c0_i32 = arith.constant 0 : i32
    %c0_i32_0 = arith.constant 0 : i32
    return %arg0, %c0_i32 : i32, i32
  }
}

</mosaic_0001>

<bundles_post_ra>
// kernel: tpu_custom_call.1
= control target key start
LH: loop header
LB: loop body
LE: loop exit
PB: predicated region body
PF: predicated region fallthrough
CT: control target
= control target key end

     0   :  { %8 = vsyncpa [#allocation3], 0  ;;  %s357_s0 = inlined_call_operand.hbm [shape: bf16[32,128], index: 0, kind: input, shape index: {}]   ;;  %s358_s1 = inlined_call_operand.hbm [shape: bf16[128,128], index: 1, kind: input, shape index: {}]   ;;  %s359_s2 = inlined_call_operand.vmem [shape: f32[1,128], index: 2, kind: input, shape index: {}]   ;;  %s360_s3 = inlined_call_operand.hbm [shape: f32[32,128], index: 3, kind: output, shape index: {}]  }
   0x1   :  { %9 = vsyncpa [#allocation6], 0 }
   0x2   :  { %10 = vsyncpa [#allocation4], 0  ;;  %s15_s14 = sshll.u32 %s357_s0, 4  ;;  %s318_s15 = smov [#allocation2]   ;;  %s16_s14 = int_to_ptr.hbm [resolvable:$true] %s15_s14 }
   0x3   :  { %s17_s16 = sshll.u32 %s318_s15, 4  ;;  %s28_s19 = sshll.u32 %s358_s1, 4  ;;  %s18_s16 = int_to_ptr.vmem [resolvable:$true] %s17_s16  ;;  %s29_s19 = int_to_ptr.hbm [resolvable:$true] %s28_s19 }
   0x4   :  { %s319_s20 = smov 64   ;;  %s320_s21 = smov 4  }
   0x5   :  { %23 = dma.hbm_to_vmem [thread:$0]  %s16_s14, 256, %s18_s16, [#allocation3], %s319_s20, %s319_s20, %s320_s21  }
   0x6   :  { %s321_s22 = smov [#allocation5]  }
   0x7   :  { %s30_s23 = sshll.u32 %s321_s22, 4  ;;  %s31_s23 = int_to_ptr.vmem [resolvable:$true] %s30_s23 }
   0x8   :  { %36 = dma.hbm_to_vmem [thread:$0]  %s29_s19, 1024, %s31_s23, [#allocation6], %s319_s20, %s319_s20, %s320_s21  }
   0x9   :  { %312 = dma.done.wait [#allocation3], 256  }
   0xa   :  { %313 = vsyncadd [#allocation3], 4294967040 }
   0xb   :  { %314 = dma.done.wait [#allocation6], 1024  }
   0xc   :  { %315 = vsyncadd [#allocation6], 4294966272  ;;  %v223_v0 = vld [vmem:[#allocation5 + $0x38] sm:$0xff]  ;;  %v222_v1 = vld [vmem:[#allocation5 + $0x30] sm:$0xff]  ;;  %s322_s24 = smov [#allocation7]   ;;  %s160_s28 = sshll.u32 %s360_s3, 4  ;;  %s161_s28 = int_to_ptr.hbm [resolvable:$true] %s160_s28 }
   0xd   :  { %131 = vmatpush.bf16.msra.mxu0 %v223_v0  ;;  %224 = vmatpush.bf16.msra.mxu1 %v223_v0  ;;  %v221_v2 = vld [vmem:[#allocation5 + $0x28] sm:$0xff]  ;;  %v220_v3 = vld [vmem:[#allocation5 + $0x20] sm:$0xff]  ;;  %v219_v4 = vld [vmem:[#allocation5 + $0x18] sm:$0xff]  ;;  %s158_s25 = sshll.u32 %s322_s24, 4  ;;  %s324_s29 = smov 8   ;;  %s159_s25 = int_to_ptr.vmem [resolvable:$true] %s158_s25 }
   0xe   :  { %v218_v5 = vld [vmem:[#allocation5 + $0x10] sm:$0xff]  ;;  %v217_v6 = vld [vmem:[#allocation5 + $0x8] sm:$0xff]  ;;  %v216_v7 = vld [vmem:[#allocation5] sm:$0xff] }
   0xf   :  { %v214_v8 = vld [vmem:[#allocation2] sm:$0xff]  ;;  %v215_v9 = vld [vmem:[#allocation2 + $0x8] sm:$0xff] }
  0x10   :  { %v239_v10 = vld [vmem:[%s359_s2] ss:$0 sm:$0xff]  ;;  %s323_s2 = smov 128  }
  0x11   :  { %132 = vmatpush.bf16.msra.mxu0 %v222_v1  ;;  %225 = vmatpush.bf16.msra.mxu1 %v222_v1 }
  0x15   :  { %133 = vmatpush.bf16.msra.mxu0 %v221_v2  ;;  %226 = vmatpush.bf16.msra.mxu1 %v221_v2 }
  0x19   :  { %134 = vmatpush.bf16.msra.mxu0 %v220_v3  ;;  %227 = vmatpush.bf16.msra.mxu1 %v220_v3 }
  0x1d   :  { %135 = vmatpush.bf16.msra.mxu0 %v219_v4  ;;  %228 = vmatpush.bf16.msra.mxu1 %v219_v4 }
  0x21   :  { %136 = vmatpush.bf16.msra.mxu0 %v218_v5  ;;  %229 = vmatpush.bf16.msra.mxu1 %v218_v5 }
  0x25   :  { %137 = vmatpush.bf16.msra.mxu0 %v217_v6  ;;  %230 = vmatpush.bf16.msra.mxu1 %v217_v6 }
  0x29   :  { %138 = vmatpush.bf16.msra.mxu0 %v216_v7  ;;  %231 = vmatpush.bf16.msra.mxu1 %v216_v7 }
  0x2c   :  { %139 = vmatmul.bf16.vlgmr.msra.gmra.mxu0 %v214_v8  ;;  %144 = vmatmul.bf16.vlgmr.msra.gmra.mxu1 %v215_v9 }
  0xa9   :  { %v140_v11 = vpop.f32.mrf.mxu0  ;;  %v145_v12 = vpop.f32.mrf.mxu1 }
  0xaa   :  { %v141_v13 = vadd.f32 %v239_v10, %v140_v11  ;;  %v146_v14 = vadd.f32 %v239_v10, %v145_v12 }
  0xac   :  { %150 = vst [vmem:[#allocation7] sm:$0xff] %v141_v13 }
  0xad   :  { %152 = vst [vmem:[#allocation7 + $0x10] sm:$0xff] %v146_v14 }
  0xb1   :  { %v142_v15 = vpop.f32.mrf.mxu0  ;;  %v147_v16 = vpop.f32.mrf.mxu1 }
  0xb2   :  { %v143_v17 = vadd.f32 %v239_v10, %v142_v15  ;;  %v148_v18 = vadd.f32 %v239_v10, %v147_v16 }
  0xb4   :  { %151 = vst [vmem:[#allocation7 + $0x8] sm:$0xff] %v143_v17 }
  0xb5   :  { %153 = vst [vmem:[#allocation7 + $0x18] sm:$0xff] %v148_v18 }
  0xb6   :  { %166 = dma.vmem_to_hbm [thread:$0]  %s159_s25, 512, %s161_s28, [#allocation4], %s323_s2, %s323_s2, %s324_s29  }
  0xb7   :  { %316 = dma.done.wait [#allocation4], 512  }
  0xb8   :  { %317 = vsyncadd [#allocation4], 4294966784 }
  0xb9   :  { %171 = vsyncpa [#allocation3], 1 }
  0xba   :  { %172 = vsyncpa [#allocation6], 1 }
  0xbb   :  { %173 = vsyncpa [#allocation4], 1 }

</bundles_post_ra>
